<compile_context>
chip_gen: v6e
topology: v6e:2x2x1
jax: 0.10.0
libtpu: 0.0.40
codegen_flags: <defaults>
</compile_context>

<pallas_src>
from functools import partial

import jax
import jax.numpy as jnp
from jax.experimental import pallas as pl
from jax.experimental.pallas import tpu as pltpu


def _tn_q_kernel(sa_ref, maps_ref, o_ref, *, S, A, D):
    # sa_ref   : (S+1, TB) f32  rows 0..S-1 = state (batch-minor), row S = action ids (as f32)
    # maps_ref : ((S+A+D)*D, 1) f32, rows k*D:(k+1)*D:
    #              k <  S        -> state_maps[k]
    #              S <= k < S+A  -> action_maps[k-S]
    #              k >= S+A      -> central_tensor[:, k-S-A, 0]   (column j of C)
    # o_ref    : (D**(S-1), TB) f32  batch-minor q block
    sa = sa_ref[...]
    maps = maps_ref[...]
    action_f = sa[S:S + 1, :]                                   # (1, TB), exact small ints in f32

    # Per-site feature maps, batch-minor: (D,1) parameter column * (1,TB) lane-dense row.
    # TODO(synk): with D=4 these tiles fill only 4 of 8 sublanes; sublane-stacking sf/af
    # would fill vregs but is negligible next to DMA / grid-step overhead at these sizes.
    sf = [maps[k * D:(k + 1) * D, :] * sa[k:k + 1, :] for k in range(S)]
    af = [maps[(S + k) * D:(S + k + 1) * D, :]
          * (action_f == float(k)).astype(jnp.float32) for k in range(A)]

    # Central contraction t[b] = sum_{i,j} sf[-1][i,b] * C[i,j] * af[-1][j,b],
    # done with pure VPU broadcast-FMAs (no MXU push/pop, no XLU reduce), exact f32.
    sfl, afl = sf[S - 1], af[A - 1]
    caf = None                                                  # caf[i,b] = sum_j C[i,j]*afl[j,b]
    for j in range(D):
        col = maps[(S + A + j) * D:(S + A + j + 1) * D, :]      # (D,1) = C[:, j]
        term = col * afl[j:j + 1, :]
        caf = term if caf is None else caf + term
    t = None                                                    # (1, TB)
    for i in range(D):
        term = sfl[i:i + 1, :] * caf[i:i + 1, :]
        t = term if t is None else t + term

    # Kronecker chain over the remaining sites, streamed straight into o_ref
    # row-slices (no in-kernel reshape copies); the final *t is folded into the leaf.
    sfaf = [sf[k] * af[k] for k in range(S - 1)]

    def emit(k, base, row_prod):
        if k == S - 2:
            o_ref[base * D:(base + 1) * D, :] = sfaf[k] * row_prod
        else:
            for m in range(D):
                emit(k + 1, base * D + m, row_prod * sfaf[k][m:m + 1, :])

    emit(0, 0, t)


@partial(jax.jit, static_argnames=("block_b",))
def tensor_network_q(state, action, state_maps, action_maps, central_tensor, *,
                     block_b=8192):
    B, S = state.shape
    S2, D = state_maps.shape
    A, D2 = action_maps.shape
    assert S == S2 and D == D2
    # The reference forward is only well-defined when state_dim == action_dim,
    # and (for state_dim > 2) when batch == 1.
    assert S == A, "reference forward requires state_dim == action_dim"
    assert S >= 2
    assert S == 2 or B == 1, "reference forward requires batch == 1 when state_dim > 2"
    out_cols = D ** (S - 1)

    f32 = lambda x: x if x.dtype == jnp.float32 else x.astype(jnp.float32)

    # ---- batch tile (lane axis) selection --------------------------------
    B128 = pl.cdiv(B, 128) * 128
    user_cap = max(128, (int(block_b) // 128) * 128)
    # keep 2x double-buffered (S+1+out_cols)-row blocks well inside every
    # generation's scoped-VMEM default (v5e: 16 MiB)
    vmem_cap = max(128, ((12 << 20) // (8 * (S + 1 + out_cols))) // 128 * 128)
    # aim for >= 2 grid steps whenever the batch allows it (v7x: one tile per TC)
    two_tile = max(128, pl.cdiv(B128 // 128, 2) * 128)
    bb = min(user_cap, vmem_cap, two_tile)
    Bp = pl.cdiv(B, bb) * bb

    # ---- layout plumbing (one fused cast+pad+transpose copy in XLA) -------
    sa = jnp.concatenate([f32(state), f32(action).reshape(B, 1)], axis=1)   # (B, S+1)
    sa_t = jnp.pad(sa, ((0, Bp - B), (0, 0))).T                             # (S+1, Bp)

    central = f32(central_tensor)[:, :, 0]                                  # (D, D)
    maps = jnp.concatenate([f32(state_maps).reshape(S * D),
                            f32(action_maps).reshape(A * D),
                            central.T.reshape(D * D)]).reshape((S + A + D) * D, 1)

    out_t = pl.pallas_call(
        partial(_tn_q_kernel, S=S, A=A, D=D),
        out_shape=jax.ShapeDtypeStruct((out_cols, Bp), jnp.float32),
        grid_spec=pltpu.PrefetchScalarGridSpec(
            num_scalar_prefetch=0,
            grid=(Bp // bb,),
            in_specs=[
                pl.BlockSpec((S + 1, bb), lambda i: (0, i)),            # fused state+action, streamed
                pl.BlockSpec(((S + A + D) * D, 1), lambda i: (0, 0)),   # all params, resident in VMEM
            ],
            out_specs=pl.BlockSpec((out_cols, bb), lambda i: (0, i)),
        ),
        compiler_params=pltpu.CompilerParams(
            dimension_semantics=("parallel",),                          # batch tiles independent
        ),
    )(sa_t, maps)

    # torch: q_value.squeeze()  -> shape (B * bond_dim**(state_dim-1),)
    return out_t[:, :B].T.reshape(-1)


def tensor_network_q_reference(state, action, state_maps, action_maps, central_tensor):
    """Literal JAX transcription of the PyTorch forward (for the S == 2 check)."""
    B, S = state.shape
    A, D = action_maps.shape
    hi = jax.lax.Precision.HIGHEST
    sf = [state[:, i:i + 1] @ state_maps[i:i + 1, :] for i in range(S)]
    onehot = jax.nn.one_hot(action, A, dtype=state.dtype)
    af = [onehot[:, i:i + 1] @ action_maps[i:i + 1, :] for i in range(A)]
    sc = sf[0]
    for i in range(1, S):
        sc = jnp.einsum('bi,bj->bij', sc, sf[i], precision=hi).reshape(-1, D)
    ac = af[0]
    for i in range(1, A):
        ac = jnp.einsum('bi,bj->bij', ac, af[i], precision=hi).reshape(-1, D)
    q = jnp.einsum('bi,bj,ijk->bk', sc, ac, central_tensor, precision=hi)
    return q.squeeze()


if __name__ == "__main__":
    # Config where the reference forward is well-defined (state_dim == action_dim).
    # B = 256 gives a 2-step pipelined grid (bb = 128) with the default tile policy.
    B, STATE_DIM, ACTION_DIM, BOND_DIM = 256, 2, 2, 4

    key = jax.random.PRNGKey(0)
    k1, k2, k3, k4, k5 = jax.random.split(key, 5)
    state_maps = jax.random.normal(k1, (STATE_DIM, BOND_DIM), jnp.float32)
    action_maps = jax.random.normal(k2, (ACTION_DIM, BOND_DIM), jnp.float32)
    central_tensor = jax.random.normal(k3, (BOND_DIM, BOND_DIM, 1), jnp.float32)
    state = jax.random.normal(k4, (B, STATE_DIM), jnp.float32)
    action = jax.random.randint(k5, (B,), 0, ACTION_DIM, jnp.int32)

    q = jax.block_until_ready(
        tensor_network_q(state, action, state_maps, action_maps, central_tensor))
    q_ref = tensor_network_q_reference(state, action, state_maps, action_maps, central_tensor)
    assert q.shape == (B * BOND_DIM ** (STATE_DIM - 1),), q.shape
    assert jnp.allclose(q, q_ref, rtol=1e-4, atol=1e-4)

    # Smoke test of the S > 2 kron-streaming path (reference requires batch == 1 there).
    S3, A3, D3 = 3, 3, 4
    k6, k7, k8, k9 = jax.random.split(key, 4)
    sm3 = jax.random.normal(k6, (S3, D3), jnp.float32)
    am3 = jax.random.normal(k7, (A3, D3), jnp.float32)
    ct3 = jax.random.normal(k8, (D3, D3, 1), jnp.float32)
    st3 = jax.random.normal(k9, (1, S3), jnp.float32)
    ac3 = jnp.array([2], jnp.int32)
    q3 = jax.block_until_ready(tensor_network_q(st3, ac3, sm3, am3, ct3))
    # Hand-derived expected value (one-hot makes it identically zero for
    # state_dim == action_dim >= 3, but it exercises the multi-store kron path).
    sf3 = [sm3[k] * st3[0, k] for k in range(S3)]
    af3 = [am3[k] * (ac3[0] == k) for k in range(A3)]
    t3 = sf3[-1] @ ct3[:, :, 0] @ af3[-1]
    exp3 = (t3 * jnp.outer(sf3[0] * af3[0], sf3[1] * af3[1])).reshape(-1)
    assert q3.shape == (D3 ** (S3 - 1),), q3.shape
    assert jnp.allclose(q3, exp3, rtol=1e-4, atol=1e-4)

    print("KERNEL_OK")
</pallas_src>

<mosaic_0001>
module attributes {stable_mosaic.version = 11 : i64} {
  func.func @_tn_q_kernel(%arg0: i32, %arg1: memref<3x128xf32, #tpu.memory_space<vmem>>, %arg2: memref<32x1xf32, #tpu.memory_space<vmem>>, %arg3: memref<4x128xf32, #tpu.memory_space<vmem>>) attributes {dimension_semantics = [#tpu.dimension_semantics<parallel>], iteration_bounds = array<i64: 2>, scalar_prefetch = 0 : i64, scratch_operands = 0 : i64, tpu.core_type = #tpu.core_type<tc>, window_params = [{transform_indices = @transform_0, window_bounds = array<i64: 3, 128>}, {pipeline_mode = #tpu.pipeline_mode<synchronous>, transform_indices = @transform_1, window_bounds = array<i64: 32, 1>}, {transform_indices = @transform_2, window_bounds = array<i64: 4, 128>}]} {
    %c0 = arith.constant 0 : index
    %c0_0 = arith.constant 0 : index
    %0 = vector.load %arg1[%c0, %c0_0] : memref<3x128xf32, #tpu.memory_space<vmem>>, vector<3x128xf32>
    %c0_1 = arith.constant 0 : index
    %c0_2 = arith.constant 0 : index
    %1 = vector.load %arg2[%c0_1, %c0_2] : memref<32x1xf32, #tpu.memory_space<vmem>>, vector<32x1xf32>
    %2 = vector.extract_strided_slice %0 {offsets = [2, 0], sizes = [1, 128], strides = [1, 1]} : vector<3x128xf32> to vector<1x128xf32>
    %3 = vector.extract_strided_slice %1 {offsets = [0, 0], sizes = [4, 1], strides = [1, 1]} : vector<32x1xf32> to vector<4x1xf32>
    %4 = vector.extract_strided_slice %0 {offsets = [0, 0], sizes = [1, 128], strides = [1, 1]} : vector<3x128xf32> to vector<1x128xf32>
    %5 = vector.broadcast %3 : vector<4x1xf32> to vector<4x128xf32>
    %6 = vector.broadcast %4 : vector<1x128xf32> to vector<4x128xf32>
    %7 = arith.mulf %5, %6 : vector<4x128xf32>
    %8 = vector.extract_strided_slice %1 {offsets = [4, 0], sizes = [4, 1], strides = [1, 1]} : vector<32x1xf32> to vector<4x1xf32>
    %9 = vector.extract_strided_slice %0 {offsets = [1, 0], sizes = [1, 128], strides = [1, 1]} : vector<3x128xf32> to vector<1x128xf32>
    %10 = vector.broadcast %8 : vector<4x1xf32> to vector<4x128xf32>
    %11 = vector.broadcast %9 : vector<1x128xf32> to vector<4x128xf32>
    %12 = arith.mulf %10, %11 : vector<4x128xf32>
    %13 = vector.extract_strided_slice %1 {offsets = [8, 0], sizes = [4, 1], strides = [1, 1]} : vector<32x1xf32> to vector<4x1xf32>
    %cst = arith.constant 0.000000e+00 : f32
    %14 = vector.broadcast %cst : f32 to vector<1x128xf32>
    %15 = arith.cmpf oeq, %2, %14 : vector<1x128xf32>
    %16 = arith.extui %15 : vector<1x128xi1> to vector<1x128xi32>
    %17 = arith.sitofp %16 : vector<1x128xi32> to vector<1x128xf32>
    %18 = vector.broadcast %13 : vector<4x1xf32> to vector<4x128xf32>
    %19 = vector.broadcast %17 : vector<1x128xf32> to vector<4x128xf32>
    %20 = arith.mulf %18, %19 : vector<4x128xf32>
    %21 = vector.extract_strided_slice %1 {offsets = [12, 0], sizes = [4, 1], strides = [1, 1]} : vector<32x1xf32> to vector<4x1xf32>
    %cst_3 = arith.constant 1.000000e+00 : f32
    %22 = vector.broadcast %cst_3 : f32 to vector<1x128xf32>
    %23 = arith.cmpf oeq, %2, %22 : vector<1x128xf32>
    %24 = arith.extui %23 : vector<1x128xi1> to vector<1x128xi32>
    %25 = arith.sitofp %24 : vector<1x128xi32> to vector<1x128xf32>
    %26 = vector.broadcast %21 : vector<4x1xf32> to vector<4x128xf32>
    %27 = vector.broadcast %25 : vector<1x128xf32> to vector<4x128xf32>
    %28 = arith.mulf %26, %27 : vector<4x128xf32>
    %29 = vector.extract_strided_slice %1 {offsets = [16, 0], sizes = [4, 1], strides = [1, 1]} : vector<32x1xf32> to vector<4x1xf32>
    %30 = vector.extract_strided_slice %28 {offsets = [0, 0], sizes = [1, 128], strides = [1, 1]} : vector<4x128xf32> to vector<1x128xf32>
    %31 = vector.broadcast %29 : vector<4x1xf32> to vector<4x128xf32>
    %32 = vector.broadcast %30 : vector<1x128xf32> to vector<4x128xf32>
    %33 = arith.mulf %31, %32 : vector<4x128xf32>
    %34 = vector.extract_strided_slice %1 {offsets = [20, 0], sizes = [4, 1], strides = [1, 1]} : vector<32x1xf32> to vector<4x1xf32>
    %35 = vector.extract_strided_slice %28 {offsets = [1, 0], sizes = [1, 128], strides = [1, 1]} : vector<4x128xf32> to vector<1x128xf32>
    %36 = vector.broadcast %34 : vector<4x1xf32> to vector<4x128xf32>
    %37 = vector.broadcast %35 : vector<1x128xf32> to vector<4x128xf32>
    %38 = arith.mulf %36, %37 : vector<4x128xf32>
    %39 = arith.addf %33, %38 : vector<4x128xf32>
    %40 = vector.extract_strided_slice %1 {offsets = [24, 0], sizes = [4, 1], strides = [1, 1]} : vector<32x1xf32> to vector<4x1xf32>
    %41 = vector.extract_strided_slice %28 {offsets = [2, 0], sizes = [1, 128], strides = [1, 1]} : vector<4x128xf32> to vector<1x128xf32>
    %42 = vector.broadcast %40 : vector<4x1xf32> to vector<4x128xf32>
    %43 = vector.broadcast %41 : vector<1x128xf32> to vector<4x128xf32>
    %44 = arith.mulf %42, %43 : vector<4x128xf32>
    %45 = arith.addf %39, %44 : vector<4x128xf32>
    %46 = vector.extract_strided_slice %1 {offsets = [28, 0], sizes = [4, 1], strides = [1, 1]} : vector<32x1xf32> to vector<4x1xf32>
    %47 = vector.extract_strided_slice %28 {offsets = [3, 0], sizes = [1, 128], strides = [1, 1]} : vector<4x128xf32> to vector<1x128xf32>
    %48 = vector.broadcast %46 : vector<4x1xf32> to vector<4x128xf32>
    %49 = vector.broadcast %47 : vector<1x128xf32> to vector<4x128xf32>
    %50 = arith.mulf %48, %49 : vector<4x128xf32>
    %51 = arith.addf %45, %50 : vector<4x128xf32>
    %52 = vector.extract_strided_slice %12 {offsets = [0, 0], sizes = [1, 128], strides = [1, 1]} : vector<4x128xf32> to vector<1x128xf32>
    %53 = vector.extract_strided_slice %51 {offsets = [0, 0], sizes = [1, 128], strides = [1, 1]} : vector<4x128xf32> to vector<1x128xf32>
    %54 = arith.mulf %52, %53 : vector<1x128xf32>
    %55 = vector.extract_strided_slice %12 {offsets = [1, 0], sizes = [1, 128], strides = [1, 1]} : vector<4x128xf32> to vector<1x128xf32>
    %56 = vector.extract_strided_slice %51 {offsets = [1, 0], sizes = [1, 128], strides = [1, 1]} : vector<4x128xf32> to vector<1x128xf32>
    %57 = arith.mulf %55, %56 : vector<1x128xf32>
    %58 = arith.addf %54, %57 : vector<1x128xf32>
    %59 = vector.extract_strided_slice %12 {offsets = [2, 0], sizes = [1, 128], strides = [1, 1]} : vector<4x128xf32> to vector<1x128xf32>
    %60 = vector.extract_strided_slice %51 {offsets = [2, 0], sizes = [1, 128], strides = [1, 1]} : vector<4x128xf32> to vector<1x128xf32>
    %61 = arith.mulf %59, %60 : vector<1x128xf32>
    %62 = arith.addf %58, %61 : vector<1x128xf32>
    %63 = vector.extract_strided_slice %12 {offsets = [3, 0], sizes = [1, 128], strides = [1, 1]} : vector<4x128xf32> to vector<1x128xf32>
    %64 = vector.extract_strided_slice %51 {offsets = [3, 0], sizes = [1, 128], strides = [1, 1]} : vector<4x128xf32> to vector<1x128xf32>
    %65 = arith.mulf %63, %64 : vector<1x128xf32>
    %66 = arith.addf %62, %65 : vector<1x128xf32>
    %67 = arith.mulf %7, %20 : vector<4x128xf32>
    %68 = vector.broadcast %66 : vector<1x128xf32> to vector<4x128xf32>
    %69 = arith.mulf %67, %68 : vector<4x128xf32>
    %c0_4 = arith.constant 0 : index
    %c0_5 = arith.constant 0 : index
    %70 = vector.load %arg3[%c0_4, %c0_5] : memref<4x128xf32, #tpu.memory_space<vmem>>, vector<4x128xf32>
    tpu.vector_store %arg3[%c0_4, %c0_5], %69 {strides = array<i32>} : memref<4x128xf32, #tpu.memory_space<vmem>>, vector<4x128xf32>,
    return
  }
  func.func @transform_0(%arg0: i32) -> (i32, i32) {
    %c0_i32 = arith.constant 0 : i32
    %c0_i32_0 = arith.constant 0 : i32
    return %c0_i32, %arg0 : i32, i32
  }
  func.func @transform_1(%arg0: i32) -> (i32, i32) {
    %c0_i32 = arith.constant 0 : i32
    %c0_i32_0 = arith.constant 0 : i32
    %c0_i32_1 = arith.constant 0 : i32
    return %c0_i32, %c0_i32_0 : i32, i32
  }
  func.func @transform_2(%arg0: i32) -> (i32, i32) {
    %c0_i32 = arith.constant 0 : i32
    %c0_i32_0 = arith.constant 0 : i32
    return %c0_i32, %arg0 : i32, i32
  }
}

</mosaic_0001>

<bundles_post_ra>
// kernel: tensor_network_q.1
= control target key start
LH: loop header
LB: loop body
LE: loop exit
PB: predicated region body
PF: predicated region fallthrough
CT: control target
= control target key end

     0   :  { %s341_s9 = smov 0   ;;  %s377_s0 = inlined_call_operand.vmem [shape: f32[3,256], index: 0, kind: input, shape index: {}]   ;;  %s378_s1 = inlined_call_operand.vmem [shape: f32[32,1], index: 1, kind: input, shape index: {}]   ;;  %s379_s2 = inlined_call_operand.vmem [shape: f32[4,256], index: 2, kind: output, shape index: {}]  }
   0x1 LB: > { %s293_s10 = sadd.s32 4294967295, %s322_s9   ;;  %p297_p0 = scmp.ge.s32.totalorder %s322_s9, 1  ;;  %s322_s9 = sphi %s341_s9, %s12_s9  }
   0x2   : > { %p111_p1 = scmp.lt.s32.totalorder %s322_s9, 3 }
   0x4   : > { %p112_p2 = pnand %p297_p0, %p111_p1 }
   0x5   : > { %p131_p3 = scmp.lt.s32.totalorder (!%p112_p2), %s293_s10, 1 }
   0x6   : > { %115 = sbr.rel (%p112_p2) target bundleno = 168 (0xa8), region = 28 }
   0xb   : > { %v143_v0 = vld [vmem:[%s378_s1 + $0x18] sm:$0xff]  ;;  %v141_v1 = vld [vmem:[%s378_s1 + $0x8] sm:$0xff]  ;;  %v324_v2 = vmov 0   ;;  %v142_v3 = vld [vmem:[%s378_s1 + $0x10] sm:$0xff]  ;;  %s381_s10 = smov (!%p131_p3, %s293_s10), 1  ;;  %v149_v5 = vlaneseq  ;;  %v325_v9 = vmov 0.0  }
   0xc   : > { %315 = vset.pattern.permute.xlu1 %v324_v2  ;;  %314 = vset.pattern.permute.xlu0 %v324_v2  ;;  %v140_v4 = vld [vmem:[%s378_s1] sm:$0xff]  ;;  %s298_s19 = sshll.u32 %s381_s10, 2 }
   0xd   : > { %201 = vperm.xlu1 %315, %v143_v0   ;;  %164 = vperm.xlu0 %314, %v141_v1   ;;  %s134_s22 = scalar_lea.vmem %s377_s0, %s298_s19  ;;  %v150_v7 = vshrl.u32 %v149_v5, 7  ;;  %s138_s25 = scalar_lea.vmem %s379_s2, %s298_s19 }
   0xe   : > { %v139_v6 = vld [vmem:[%s134_s22] sm:$0x7] }
   0xf   : > { %vm172_vm0 = vcmp.eq.f32.partialorder %v139_v6, 1.0  ;;  %v169_v8 = vsub.s32 2, %v150_v7  ;;  %v187_v12 = vsub.s32 4, %v150_v7  ;;  %v192_v13 = vsub.s32 5, %v150_v7 }
  0x10   : > { %v301_v10 = vsel %vm172_vm0, 1.0, %v325_v9  ;;  %v212_v14 = vsub.s32 7, %v150_v7  ;;  %v206_v17 = vsub.s32 6, %v150_v7  ;;  %v156_v27 = vsub.s32 1, %v150_v7 }
  0x11   : > { %182 = vperm.xlu0 %314, %v142_v3   ;;  %146 = vperm.xlu1 %315, %v140_v4   ;;  %v178_v11 = vrot.slane %v301_v10, %v169_v8  ;;  %vm159_vm1 = vcmp.eq.f32.partialorder %v139_v6, 0.0  ;;  %v151_v36 = vsub.s32 0, %v150_v7 }
  0x12   : > { %v157_v32 = vrot.slane %v139_v6, %v156_v27  ;;  %v300_v40 = vsel %vm159_vm1, 1.0, %v325_v9 }
  0x13   : > { %v152_v41 = vrot.slane %v139_v6, %v151_v36  ;;  %v170_v43 = vrot.slane %v300_v40, %v169_v8 }
  0x88   : > { %v165_v15 = vpop.permute.xlu0 %164  ;;  %v202_v24 = vpop.permute.xlu1 %201 }
  0x89   : > { %v179_v16 = vmul.f32 %v178_v11, %v165_v15  ;;  %v171_v49 = vmul.f32 %v170_v43, %v165_v15 }
  0x8b   : > { %v188_v18 = vrot.slane %v179_v16, %v187_v12  ;;  %v193_v19 = vrot.slane %v179_v16, %v192_v13  ;;  %v213_v20 = vrot.slane %v179_v16, %v212_v14  ;;  %v207_v23 = vrot.slane %v179_v16, %v206_v17 }
  0x8c   : > { %v183_v21 = vpop.permute.xlu0 %182  ;;  %v147_v35 = vpop.permute.xlu1 %146 }
  0x8d   : > { %v194_v22 = vmul.f32 %v193_v19, %v183_v21  ;;  %v189_v25 = vmul.f32 %v188_v18, %v183_v21  ;;  %v214_v28 = vmul.f32 %v213_v20, %v202_v24  ;;  %v208_v30 = vmul.f32 %v207_v23, %v202_v24 }
  0x8e   : > { %v158_v37 = vmul.f32 %v157_v32, %v147_v35  ;;  %v153_v46 = vmul.f32 %v152_v41, %v147_v35 }
  0x8f   : > { %v196_v26 = vrot.slane %v194_v22, 4  ;;  %v216_v33 = vrot.slane %v214_v28, 4 }
  0x90   : > { %v233_v51 = vmul.f32 %v171_v49, %v153_v46 }
  0x91   : > { %v198_v29 = vadd.f32 %v196_v26, %v189_v25 }
  0x93   : > { %v209_v31 = vadd.f32 %v208_v30, %v198_v29 }
  0x95   : > { %v218_v34 = vadd.f32 %v216_v33, %v209_v31 }
  0x97   : > { %v220_v38 = vrot.slane %v218_v34, 4 }
  0x99   : > { %v222_v39 = vmul.f32 %v220_v38, %v158_v37 }
  0x9b   : > { %v224_v42 = vrot.slane %v222_v39, 1  ;;  %v227_v45 = vrot.slane %v222_v39, 2  ;;  %v230_v48 = vrot.slane %v222_v39, 3 }
  0x9d   : > { %v226_v44 = vadd.f32 %v224_v42, %v222_v39 }
  0x9f   : > { %v229_v47 = vadd.f32 %v227_v45, %v226_v44 }
  0xa1   : > { %v232_v50 = vadd.f32 %v230_v48, %v229_v47 }
  0xa3   : > { %v237_v52 = vrot.slane %v232_v50, %v187_v12 }
  0xa5   : > { %v238_v53 = vmul.f32 %v237_v52, %v233_v51 }
  0xa7   : > { %239 = vst [vmem:[%s138_s25] sm:$0xf] %v238_v53 }
  0xa8 PF: > { %s12_s9 = sadd.s32 1, %s322_s9  }
  0xa9   : > { %p9_p4 = scmp.ge.s32.totalorder %s12_s9, 4  }
  0xab   :  { %11 = sbr.rel (!%p9_p4) target bundleno = 1 (0x1), region = 58 }

</bundles_post_ra>
